<compile_context>
chip_gen: v7x
topology: tpu7x:2x2x1
jax: 0.10.0
libtpu: 0.0.40
codegen_flags: <defaults>
</compile_context>

<pallas_src>
import functools

import jax
import jax.numpy as jnp
from jax.experimental import pallas as pl
from jax.experimental.pallas import tpu as pltpu


def _pearson_tile_kernel(pred_ref, target_ref, corr_ref, sqdiff_ref, *, eps):
    """One (T, F_TILE) feature tile -> per-feature corr and per-feature Σ(p−t)²."""
    pred = pred_ref[...].astype(jnp.float32)   # (T, F_TILE)
    tgt = target_ref[...].astype(jnp.float32)  # (T, F_TILE)

    # Exact two-pass centering: the full T axis is present in every tile.
    p_mean = jnp.mean(pred, axis=0, keepdims=True)
    t_mean = jnp.mean(tgt, axis=0, keepdims=True)
    p_c = pred - p_mean
    t_c = tgt - t_mean

    num = jnp.sum(p_c * t_c, axis=0, keepdims=True)            # (1, F_TILE)
    p_var = jnp.sum(p_c * p_c, axis=0, keepdims=True)          # (1, F_TILE)
    t_var = jnp.sum(t_c * t_c, axis=0, keepdims=True)          # (1, F_TILE)
    denom = jnp.maximum(jnp.sqrt(p_var * t_var), jnp.float32(eps))

    corr_ref[...] = num / denom                                 # per-feature corr

    diff = pred - tgt
    sqdiff_ref[...] = jnp.sum(diff * diff, axis=0, keepdims=True)


def _choose_f_tile(T: int, F: int) -> int:
    """Pick a lane-dense feature tile sized for the smallest-VMEM generation.

    Budget: double-buffered inputs (2 arrays x 2 buffers) plus a few f32
    temporaries ~= 8 * T * F_TILE * 4 bytes, kept under ~16 MiB so the kernel
    fits comfortably in the 32 MiB scoped-VMEM request on v5e/v6e/v7x.
    """
    if F <= 1024:
        return F  # small feature dim: single whole-F block (always legal).
    max_elems = 512 * 1024                     # T * F_TILE <= 512K f32 elements
    tile = (max_elems // max(T, 1)) // 128 * 128
    tile = max(128, min(tile, 1024))
    return min(tile, F)
    # TODO(synk): for extremely long T the (T, F_TILE) block itself can exceed
    # VMEM; that would additionally require tiling T with partial-sum scratch.


def pearson_corr_loss(pred, target, eps: float = 1e-6, lambda_mse: float = 0.2,
                      f_tile: int | None = None):
    """Composite loss = -Corr + lambda * MSE.  pred, target: (T, F) -> scalar."""
    assert pred.shape == target.shape and pred.ndim == 2
    T, F = pred.shape
    if f_tile is None:
        f_tile = _choose_f_tile(T, F)
    grid = (pl.cdiv(F, f_tile),)

    kernel = functools.partial(_pearson_tile_kernel, eps=float(eps))

    corr, sqdiff = pl.pallas_call(
        kernel,
        grid=grid,
        in_specs=[
            pl.BlockSpec((T, f_tile), lambda j: (0, j)),   # pred tile
            pl.BlockSpec((T, f_tile), lambda j: (0, j)),   # target tile
        ],
        out_specs=(
            pl.BlockSpec((1, f_tile), lambda j: (0, j)),   # per-feature corr
            pl.BlockSpec((1, f_tile), lambda j: (0, j)),   # per-feature Σ(p−t)²
        ),
        out_shape=(
            jax.ShapeDtypeStruct((1, F), jnp.float32),
            jax.ShapeDtypeStruct((1, F), jnp.float32),
        ),
        compiler_params=pltpu.CompilerParams(
            dimension_semantics=("parallel",),             # shard tiles on v7x 2xTC
            vmem_limit_bytes=32 * 1024 * 1024,
        ),
    )(pred, target)

    # Tiny final reductions over F done in plain JAX (exact-size arrays, so any
    # padded remainder tile never contributes).
    corr_loss = -jnp.mean(corr)
    mse_loss = jnp.sum(sqdiff) / jnp.float32(T * F)
    return corr_loss + lambda_mse * mse_loss


def _reference(pred, target, eps=1e-6, lambda_mse=0.2):
    pred = pred.astype(jnp.float32)
    target = target.astype(jnp.float32)
    p_c = pred - jnp.mean(pred, axis=0, keepdims=True)
    t_c = target - jnp.mean(target, axis=0, keepdims=True)
    num = jnp.sum(p_c * t_c, axis=0)
    denom = jnp.maximum(
        jnp.sqrt(jnp.sum(p_c ** 2, axis=0) * jnp.sum(t_c ** 2, axis=0)), eps
    )
    corr_loss = -jnp.mean(num / denom)
    mse_loss = jnp.mean((pred - target) ** 2)
    return corr_loss + lambda_mse * mse_loss


if __name__ == "__main__":
    key = jax.random.PRNGKey(0)

    # Case 1: small (T, F) consistent with forward(pred, target), single block.
    T, F = 8, 32
    k1, k2, key = jax.random.split(key, 3)
    pred = jax.random.normal(k1, (T, F), dtype=jnp.float32)
    target = 0.7 * pred + 0.3 * jax.random.normal(k2, (T, F), dtype=jnp.float32)
    loss = jax.block_until_ready(pearson_corr_loss(pred, target))
    ref = jax.block_until_ready(_reference(pred, target))
    assert jnp.allclose(loss, ref, atol=1e-5, rtol=1e-5), (loss, ref)

    # Case 2: exercise the tiled / parallel-grid path (F_TILE=128, grid=4).
    T2, F2 = 16, 512
    k3, k4, key = jax.random.split(key, 3)
    pred2 = jax.random.normal(k3, (T2, F2), dtype=jnp.float32)
    target2 = 0.5 * pred2 + 0.5 * jax.random.normal(k4, (T2, F2), dtype=jnp.float32)
    loss2 = jax.block_until_ready(pearson_corr_loss(pred2, target2, f_tile=128))
    ref2 = jax.block_until_ready(_reference(pred2, target2))
    assert jnp.allclose(loss2, ref2, atol=1e-5, rtol=1e-5), (loss2, ref2)

    # Case 3: bf16 inputs streamed natively (widened to f32 inside the kernel).
    k5, k6, key = jax.random.split(key, 3)
    pred3 = jax.random.normal(k5, (T2, 256), dtype=jnp.float32).astype(jnp.bfloat16)
    target3 = jax.random.normal(k6, (T2, 256), dtype=jnp.float32).astype(jnp.bfloat16)
    loss3 = jax.block_until_ready(pearson_corr_loss(pred3, target3, f_tile=128))
    ref3 = jax.block_until_ready(_reference(pred3, target3))
    assert jnp.allclose(loss3, ref3, atol=1e-4, rtol=1e-4), (loss3, ref3)

    print("KERNEL_OK")
</pallas_src>

<mosaic_0001>
module attributes {stable_mosaic.version = 11 : i64} {
  func.func @_pearson_tile_kernel(%arg0: i32, %arg1: memref<8x32xf32, #tpu.memory_space<vmem>>, %arg2: memref<8x32xf32, #tpu.memory_space<vmem>>, %arg3: memref<1x32xf32, #tpu.memory_space<vmem>>, %arg4: memref<1x32xf32, #tpu.memory_space<vmem>>) attributes {dimension_semantics = [#tpu.dimension_semantics<parallel>], iteration_bounds = array<i64: 1>, scalar_prefetch = 0 : i64, scratch_operands = 0 : i64, tpu.core_type = #tpu.core_type<tc>, window_params = [{transform_indices = @transform_0, window_bounds = array<i64: 8, 32>}, {transform_indices = @transform_1, window_bounds = array<i64: 8, 32>}, {transform_indices = @transform_2, window_bounds = array<i64: 1, 32>}, {transform_indices = @transform_3, window_bounds = array<i64: 1, 32>}]} {
    %c0 = arith.constant 0 : index
    %c0_0 = arith.constant 0 : index
    %0 = vector.load %arg1[%c0, %c0_0] : memref<8x32xf32, #tpu.memory_space<vmem>>, vector<8x32xf32>
    %c0_1 = arith.constant 0 : index
    %c0_2 = arith.constant 0 : index
    %1 = vector.load %arg2[%c0_1, %c0_2] : memref<8x32xf32, #tpu.memory_space<vmem>>, vector<8x32xf32>
    %cst = arith.constant dense<0.000000e+00> : vector<32xf32>
    %2 = vector.multi_reduction <add>, %0, %cst [0] : vector<8x32xf32> to vector<32xf32>
    %3 = vector.shape_cast %2 : vector<32xf32> to vector<1x32xf32>
    %cst_3 = arith.constant 8.000000e+00 : f32
    %4 = vector.broadcast %cst_3 : f32 to vector<1x32xf32>
    %5 = arith.divf %3, %4 : vector<1x32xf32>
    %cst_4 = arith.constant dense<0.000000e+00> : vector<32xf32>
    %6 = vector.multi_reduction <add>, %1, %cst_4 [0] : vector<8x32xf32> to vector<32xf32>
    %7 = vector.shape_cast %6 : vector<32xf32> to vector<1x32xf32>
    %cst_5 = arith.constant 8.000000e+00 : f32
    %8 = vector.broadcast %cst_5 : f32 to vector<1x32xf32>
    %9 = arith.divf %7, %8 : vector<1x32xf32>
    %10 = vector.broadcast %5 : vector<1x32xf32> to vector<8x32xf32>
    %11 = arith.subf %0, %10 : vector<8x32xf32>
    %12 = vector.broadcast %9 : vector<1x32xf32> to vector<8x32xf32>
    %13 = arith.subf %1, %12 : vector<8x32xf32>
    %14 = arith.mulf %11, %13 : vector<8x32xf32>
    %cst_6 = arith.constant dense<0.000000e+00> : vector<32xf32>
    %15 = vector.multi_reduction <add>, %14, %cst_6 [0] : vector<8x32xf32> to vector<32xf32>
    %16 = vector.shape_cast %15 : vector<32xf32> to vector<1x32xf32>
    %17 = arith.mulf %11, %11 : vector<8x32xf32>
    %cst_7 = arith.constant dense<0.000000e+00> : vector<32xf32>
    %18 = vector.multi_reduction <add>, %17, %cst_7 [0] : vector<8x32xf32> to vector<32xf32>
    %19 = vector.shape_cast %18 : vector<32xf32> to vector<1x32xf32>
    %20 = arith.mulf %13, %13 : vector<8x32xf32>
    %cst_8 = arith.constant dense<0.000000e+00> : vector<32xf32>
    %21 = vector.multi_reduction <add>, %20, %cst_8 [0] : vector<8x32xf32> to vector<32xf32>
    %22 = vector.shape_cast %21 : vector<32xf32> to vector<1x32xf32>
    %23 = arith.mulf %19, %22 : vector<1x32xf32>
    %24 = math.sqrt %23 : vector<1x32xf32>
    %cst_9 = arith.constant 9.99999997E-7 : f32
    %25 = vector.broadcast %cst_9 : f32 to vector<1x32xf32>
    %26 = arith.maximumf %24, %25 : vector<1x32xf32>
    %27 = arith.divf %16, %26 : vector<1x32xf32>
    %c0_10 = arith.constant 0 : index
    %c0_11 = arith.constant 0 : index
    %28 = vector.load %arg3[%c0_10, %c0_11] : memref<1x32xf32, #tpu.memory_space<vmem>>, vector<1x32xf32>
    tpu.vector_store %arg3[%c0_10, %c0_11], %27 {strides = array<i32>} : memref<1x32xf32, #tpu.memory_space<vmem>>, vector<1x32xf32>,
    %29 = arith.subf %0, %1 : vector<8x32xf32>
    %30 = arith.mulf %29, %29 : vector<8x32xf32>
    %cst_12 = arith.constant dense<0.000000e+00> : vector<32xf32>
    %31 = vector.multi_reduction <add>, %30, %cst_12 [0] : vector<8x32xf32> to vector<32xf32>
    %32 = vector.shape_cast %31 : vector<32xf32> to vector<1x32xf32>
    %c0_13 = arith.constant 0 : index
    %c0_14 = arith.constant 0 : index
    %33 = vector.load %arg4[%c0_13, %c0_14] : memref<1x32xf32, #tpu.memory_space<vmem>>, vector<1x32xf32>
    tpu.vector_store %arg4[%c0_13, %c0_14], %32 {strides = array<i32>} : memref<1x32xf32, #tpu.memory_space<vmem>>, vector<1x32xf32>,
    return
  }
  func.func @transform_0(%arg0: i32) -> (i32, i32) {
    %c0_i32 = arith.constant 0 : i32
    %c0_i32_0 = arith.constant 0 : i32
    return %c0_i32, %arg0 : i32, i32
  }
  func.func @transform_1(%arg0: i32) -> (i32, i32) {
    %c0_i32 = arith.constant 0 : i32
    %c0_i32_0 = arith.constant 0 : i32
    return %c0_i32, %arg0 : i32, i32
  }
  func.func @transform_2(%arg0: i32) -> (i32, i32) {
    %c0_i32 = arith.constant 0 : i32
    %c0_i32_0 = arith.constant 0 : i32
    return %c0_i32, %arg0 : i32, i32
  }
  func.func @transform_3(%arg0: i32) -> (i32, i32) {
    %c0_i32 = arith.constant 0 : i32
    %c0_i32_0 = arith.constant 0 : i32
    return %c0_i32, %arg0 : i32, i32
  }
}

</mosaic_0001>

<bundles_post_ra>
// kernel: tpu_custom_call.1
= control target key start
LH: loop header
LB: loop body
LE: loop exit
PB: predicated region body
PF: predicated region fallthrough
CT: control target
= control target key end

     0   :  { %9 = vsyncpa [#allocation3], 0  ;;  %s322_s0 = inlined_call_operand.hbm [shape: f32[8,32], index: 0, kind: input, shape index: {}]   ;;  %s323_s1 = inlined_call_operand.hbm [shape: f32[8,32], index: 1, kind: input, shape index: {}]   ;;  %s324_s2 = inlined_call_operand.hbm [shape: f32[1,32], index: 2, kind: output, shape index: {0}]   ;;  %s325_s3 = inlined_call_operand.hbm [shape: f32[1,32], index: 3, kind: output, shape index: {1}]  }
   0x1   :  { %10 = vsyncpa [#allocation6], 0 }
   0x2   :  { %11 = vsyncpa [#allocation4], 0 }
   0x3   :  { %12 = vsyncpa [#allocation9], 0  ;;  %s242_s12 = smov [#allocation2]   ;;  %s243_s14 = smov [#allocation5]  }
   0x4   :  { %s19_s13 = sshll.u32 %s242_s12, 4  ;;  %s29_s15 = sshll.u32 %s243_s14, 4  ;;  %s20_s13 = int_to_ptr.vmem [resolvable:$true] %s19_s13  ;;  %s30_s15 = int_to_ptr.vmem [resolvable:$true] %s29_s15 }
   0x5   :  { %s146_s18 = scalar_lea.hbm %s322_s0, 128 }
   0x6   :  { %p147_p0 = scmp.ne.s32.totalorder %s322_s0, %s146_s18  ;;  %p150_p1 = scmp.lt.u32.totalorder %s146_s18, %s322_s0 }
   0x8   :  { %p152_p2 = pnand %p150_p1, %p147_p0 }
   0xa   :  { %155 = shalt.err (!%p152_p2)
}
   0xb   :  { %s156_s23 = scalar_lea.vmem %s20_s13, 128  ;;  %p161_p4 = scmp.lt.s32.totalorder %s20_s13, %s20_s13 }
   0xc   :  { %p157_p3 = scmp.ne.s32.totalorder %s20_s13, %s156_s23  ;;  %p162_p5 = scmp.lt.s32.totalorder %s156_s23, %s156_s23 }
   0xe   :  { %p163_p6 = por %p162_p5, %p161_p4 }
  0x10   :  { %p164_p7 = pnand %p163_p6, %p157_p3 }
  0x12   :  { %167 = shalt.err (!%p164_p7)
}
  0x13   :  { %22 = dma.hbm_to_vmem [thread:$0]  %s322_s0, 128, %s20_s13, [#allocation3]  }
  0x14   :  { %s168_s28 = scalar_lea.hbm %s323_s1, 128 }
  0x15   :  { %p169_p8 = scmp.ne.s32.totalorder %s323_s1, %s168_s28  ;;  %p172_p9 = scmp.lt.u32.totalorder %s168_s28, %s323_s1 }
  0x17   :  { %p174_p10 = pnand %p172_p9, %p169_p8 }
  0x19   :  { %177 = shalt.err (!%p174_p10)
}
  0x1a   :  { %s178_s6 = scalar_lea.vmem %s30_s15, 128  ;;  %p183_p12 = scmp.lt.s32.totalorder %s30_s15, %s30_s15 }
  0x1b   :  { %p179_p11 = scmp.ne.s32.totalorder %s30_s15, %s178_s6  ;;  %p184_p13 = scmp.lt.s32.totalorder %s178_s6, %s178_s6 }
  0x1d   :  { %p185_p0 = por %p184_p13, %p183_p12 }
  0x1f   :  { %p186_p1 = pnand %p185_p0, %p179_p11 }
  0x21   :  { %189 = shalt.err (!%p186_p1)
}
  0x22   :  { %32 = dma.hbm_to_vmem [thread:$0]  %s323_s1, 128, %s30_s15, [#allocation6]  }
  0x23   :  { %234 = dma.done.wait [#allocation3], 128  }
  0x24   :  { %235 = vsyncadd [#allocation3], 4294967168 }
  0x25   :  { %236 = dma.done.wait [#allocation6], 128  }
  0x26   :  { %237 = vsyncadd [#allocation6], 4294967168  ;;  %vm41_vm0 = vcmask 261120   ;;  %v39_v0 = vld [vmem:[#allocation2] sm:$0xff]  ;;  %v40_v1 = vld [vmem:[#allocation5] sm:$0xff]  ;;  %s244_s1 = smov [#allocation8]  }
  0x27   :  { %v42_v2 = vsel %vm41_vm0, %v39_v0, 0.0  ;;  %v51_v3 = vsel %vm41_vm0, %v40_v1, 0.0  ;;  %v98_v4 = vsub.f32 %v39_v0, %v40_v1  ;;  %s124_s8 = sshll.u32 %s244_s1, 4  ;;  %vm96_vm1 = vcmask 253952   ;;  %s125_s8 = int_to_ptr.vmem [resolvable:$true] %s124_s8 }
  0x28   :  { %v43_v5 = vrot.slane %v42_v2, 4  ;;  %v52_v6 = vrot.slane %v51_v3, 4  ;;  %s190_s9 = scalar_lea.vmem %s125_s8, 16  ;;  %s194_s10 = scalar_lea.vmem %s125_s8, 32 }
  0x29   :  { %v99_v7 = vmul.f32 %v98_v4, %v98_v4  ;;  %p191_p2 = scmp.ne.s32.totalorder %s125_s8, %s190_s9  ;;  %p195_p3 = scmp.lt.s32.totalorder %s125_s8, %s125_s8 }
  0x2a   :  { %v44_v8 = vadd.f32 %v43_v5, %v42_v2  ;;  %v53_v9 = vadd.f32 %v52_v6, %v51_v3  ;;  %p196_p4 = scmp.lt.s32.totalorder %s194_s10, %s190_s9 }
  0x2b   :  { %v100_v10 = vsel %vm41_vm0, %v99_v7, 0.0 }
  0x2c   :  { %v45_v11 = vrot.slane %v44_v8, 2  ;;  %v54_v12 = vrot.slane %v53_v9, 2  ;;  %v101_v13 = vrot.slane %v100_v10, 4  ;;  %p197_p5 = por %p196_p4, %p195_p3 }
  0x2e   :  { %v46_v14 = vadd.f32 %v45_v11, %v44_v8  ;;  %v55_v15 = vadd.f32 %v54_v12, %v53_v9  ;;  %v102_v16 = vadd.f32 %v101_v13, %v100_v10  ;;  %p198_p6 = pnand %p197_p5, %p191_p2 }
  0x30   :  { %v47_v17 = vrot.slane %v46_v14, 1  ;;  %v56_v18 = vrot.slane %v55_v15, 1  ;;  %v103_v19 = vrot.slane %v102_v16, 2 }
  0x32   :  { %v48_v20 = vadd.f32 %v47_v17, %v46_v14  ;;  %v57_v21 = vadd.f32 %v56_v18, %v55_v15  ;;  %v104_v22 = vadd.f32 %v103_v19, %v102_v16 }
  0x34   :  { %v50_v23 = vmul.f32 0.125, %v48_v20  ;;  %v58_v24 = vmul.f32 0.125, %v57_v21  ;;  %v105_v25 = vrot.slane %v104_v22, 1 }
  0x36   :  { %v59_v26 = vsub.f32 %v39_v0, %v50_v23  ;;  %v60_v27 = vsub.f32 %v40_v1, %v58_v24  ;;  %v106_v28 = vadd.f32 %v105_v25, %v104_v22 }
  0x38   :  { %v69_v29 = vmul.f32 %v59_v26, %v59_v26  ;;  %v77_v30 = vmul.f32 %v60_v27, %v60_v27  ;;  %107 = vst.msk [vmem:[#allocation8] sm:$0x1] %vm96_vm1, %v106_v28 }
  0x39   :  { %201 = shalt.err (!%p198_p6)
}
  0x3a   :  { %s202_s13 = scalar_lea.hbm %s325_s3, 16 }
  0x3b   :  { %p203_p7 = scmp.ne.s32.totalorder %s325_s3, %s202_s13  ;;  %p206_p8 = scmp.lt.u32.totalorder %s202_s13, %s325_s3 }
  0x3d   :  { %p208_p9 = pnand %p206_p8, %p203_p7 }
  0x3f   :  { %211 = shalt.err (!%p208_p9)
}
  0x40   :  { %127 = dma.vmem_to_hbm [thread:$0]  %s125_s8, 16, %s325_s3, [#allocation9]   ;;  %v70_v31 = vsel %vm41_vm0, %v69_v29, 0.0  ;;  %v78_v32 = vsel %vm41_vm0, %v77_v30, 0.0  ;;  %v61_v45 = vmul.f32 %v60_v27, %v59_v26 }
  0x41   :  { %v71_v33 = vrot.slane %v70_v31, 4  ;;  %v79_v34 = vrot.slane %v78_v32, 4  ;;  %s245_s3 = smov [#allocation7]  }
  0x42   :  { %v62_v47 = vsel %vm41_vm0, %v61_v45, 0.0  ;;  %s114_s20 = sshll.u32 %s245_s3, 4  ;;  %s115_s20 = int_to_ptr.vmem [resolvable:$true] %s114_s20 }
  0x43   :  { %v72_v35 = vadd.f32 %v71_v33, %v70_v31  ;;  %v80_v36 = vadd.f32 %v79_v34, %v78_v32  ;;  %v63_v48 = vrot.slane %v62_v47, 4  ;;  %s212_s21 = scalar_lea.vmem %s115_s20, 16  ;;  %s216_s22 = scalar_lea.vmem %s115_s20, 32 }
  0x44   :  { %p213_p10 = scmp.ne.s32.totalorder %s115_s20, %s212_s21  ;;  %p217_p11 = scmp.lt.s32.totalorder %s115_s20, %s115_s20 }
  0x45   :  { %v73_v37 = vrot.slane %v72_v35, 2  ;;  %v81_v38 = vrot.slane %v80_v36, 2  ;;  %v64_v49 = vadd.f32 %v63_v48, %v62_v47  ;;  %p218_p12 = scmp.lt.s32.totalorder %s216_s22, %s212_s21 }
  0x47   :  { %v74_v39 = vadd.f32 %v73_v37, %v72_v35  ;;  %v82_v40 = vadd.f32 %v81_v38, %v80_v36  ;;  %v65_v53 = vrot.slane %v64_v49, 2  ;;  %p219_p13 = por %p218_p12, %p217_p11 }
  0x49   :  { %v75_v41 = vrot.slane %v74_v39, 1  ;;  %v83_v42 = vrot.slane %v82_v40, 1  ;;  %v66_v57 = vadd.f32 %v65_v53, %v64_v49  ;;  %p220_p0 = pnand %p219_p13, %p213_p10 }
  0x4b   :  { %v76_v43 = vadd.f32 %v75_v41, %v74_v39  ;;  %v84_v44 = vadd.f32 %v83_v42, %v82_v40  ;;  %v67_v58 = vrot.slane %v66_v57, 1 }
  0x4d   :  { %v85_v46 = vmul.f32 %v84_v44, %v76_v43  ;;  %v68_v59 = vadd.f32 %v67_v58, %v66_v57 }
  0x4f   :  { %142 = vrsqrt.f32 %v85_v46  ;;  %vm88_vm2 = vcmp.eq.f32.partialorder %v85_v46, inf  ;;  %v91_v51 = vand.u32 2147483648, %v85_v46  ;;  %vm90_vm3 = vcmp.eq.f32.partialorder %v85_v46, 0.0 }
  0x59   :  { %v143_v50 = vpop.eup %142 }
  0x5a   :  { %v87_v52 = vmul.f32 %v143_v50, %v85_v46 }
  0x5c   :  { %v89_v54 = vsel %vm88_vm2, %v85_v46, %v87_v52 }
  0x5d   :  { %v92_v55 = vsel %vm90_vm3, %v91_v51, %v89_v54 }
  0x5e   :  { %v93_v56 = vmax.f32 %v92_v55, 1e-06 }
  0x60   :  { %144 = vrcp.f32 %v93_v56 }
  0x6a   :  { %v145_v60 = vpop.eup %144 }
  0x6b   :  { %v95_v61 = vmul.f32 %v145_v60, %v68_v59 }
  0x6d   :  { %97 = vst.msk [vmem:[#allocation7] sm:$0x1] %vm96_vm1, %v95_v61 }
  0x6e   :  { %223 = shalt.err (!%p220_p0)
}
  0x6f   :  { %s224_s25 = scalar_lea.hbm %s324_s2, 16 }
  0x70   :  { %p225_p1 = scmp.ne.s32.totalorder %s324_s2, %s224_s25  ;;  %p228_p2 = scmp.lt.u32.totalorder %s224_s25, %s324_s2 }
  0x72   :  { %p230_p3 = pnand %p228_p2, %p225_p1 }
  0x74   :  { %233 = shalt.err (!%p230_p3)
}
  0x75   :  { %117 = dma.vmem_to_hbm [thread:$0]  %s115_s20, 16, %s324_s2, [#allocation4]  }
  0x76   :  { %238 = dma.done.wait [#allocation4], 16  }
  0x77   :  { %239 = vsyncadd [#allocation4], 4294967280 }
  0x78   :  { %240 = dma.done.wait [#allocation9], 16  }
  0x79   :  { %241 = vsyncadd [#allocation9], 4294967280 }
  0x7a   :  { %134 = vsyncpa [#allocation3], 1 }
  0x7b   :  { %135 = vsyncpa [#allocation6], 1 }
  0x7c   :  { %136 = vsyncpa [#allocation4], 1 }
  0x7d   :  { %137 = vsyncpa [#allocation9], 1 }

</bundles_post_ra>
